<compile_context>
chip_gen: v5e
topology: v5e:2x2
jax: 0.10.0
libtpu: 0.0.40
codegen_flags: <defaults>
</compile_context>

<pallas_src>
import jax
import jax.numpy as jnp
from jax.experimental import pallas as pl
from jax.experimental.pallas import tpu as pltpu

_LANE = 128
_SUBLANE_BF16 = 16  # bf16 packs two rows per 32-bit sublane


def _round_up(n, m):
    return ((n + m - 1) // m) * m


def _mlp_kernel(x_ref, w1_ref, b1_ref, w2_ref, b2_ref, o_ref):
    # Layer 1: bf16 operands on the MXU, f32 accumulation.
    h = jnp.dot(x_ref[...], w1_ref[...], preferred_element_type=jnp.float32)
    h = jnp.maximum(h + b1_ref[...], 0.0)  # bias + ReLU in f32 (VPU)

    # Layer 2: cast activations to bf16 for the MXU, accumulate in f32.
    y = jnp.dot(h.astype(jnp.bfloat16), w2_ref[...],
                preferred_element_type=jnp.float32)
    y = jnp.maximum(y + b2_ref[...], 0.0)

    o_ref[...] = y.astype(o_ref.dtype)


def prepare_params(w1, b1, w2, b2):
    """One-time parameter prep: pad hidden axis to 128 lanes, cast to bf16.

    w1: (input_dim, hidden)  -- torch fc1.weight transposed
    w2: (hidden, hidden)     -- torch fc2.weight transposed
    Returns (padded params tuple, hidden_dim).
    """
    K, H = w1.shape
    Hp = _round_up(H, _LANE)
    # Zero padding is exact through matmul + bias + ReLU.
    w1p = jnp.zeros((K, Hp), jnp.bfloat16).at[:, :H].set(w1.astype(jnp.bfloat16))
    w2p = jnp.zeros((Hp, Hp), jnp.bfloat16).at[:H, :H].set(w2.astype(jnp.bfloat16))
    b1p = jnp.zeros((1, Hp), jnp.float32).at[0, :H].set(b1.astype(jnp.float32))
    b2p = jnp.zeros((1, Hp), jnp.float32).at[0, :H].set(b2.astype(jnp.float32))
    return (w1p, b1p, w2p, b2p), H


def passing_leaders_forward(x, padded_params, hidden_dim, *, block_m=512):
    """relu(relu(x @ W1 + b1) @ W2 + b2) with pre-padded bf16 params."""
    w1p, b1p, w2p, b2p = padded_params
    B, K = x.shape
    Hp = w1p.shape[1]
    out_dtype = x.dtype

    # Batch tile: multiple of 16 (bf16 sublane pair).  For B > one tile, split
    # into at least 2 grid steps so both v7x TensorCores run ("parallel" axis).
    if B <= _SUBLANE_BF16:
        bm = _round_up(max(B, 1), _SUBLANE_BF16)
    else:
        bm = min(block_m, _round_up(pl.cdiv(B, 2), _SUBLANE_BF16))
    Bp = _round_up(B, bm)

    # Only per-call prep: cast x to bf16 (+ tiny batch pad when needed).
    # K stays unpadded: block last dim == full array dim is legal.
    xb = x.astype(jnp.bfloat16)
    if Bp != B:
        xb = jnp.pad(xb, ((0, Bp - B), (0, 0)))

    grid = (Bp // bm,)

    out = pl.pallas_call(
        _mlp_kernel,
        out_shape=jax.ShapeDtypeStruct((Bp, Hp), out_dtype),
        grid=grid,
        in_specs=[
            pl.BlockSpec((bm, K), lambda i: (i, 0)),    # x: tiled over batch
            pl.BlockSpec((K, Hp), lambda i: (0, 0)),    # W1: VMEM-resident
            pl.BlockSpec((1, Hp), lambda i: (0, 0)),    # b1
            pl.BlockSpec((Hp, Hp), lambda i: (0, 0)),   # W2: VMEM-resident
            pl.BlockSpec((1, Hp), lambda i: (0, 0)),    # b2
        ],
        out_specs=pl.BlockSpec((bm, Hp), lambda i: (i, 0)),
        compiler_params=pltpu.CompilerParams(
            # Batch tiles are independent -> shardable across TCs (v7x megacore).
            dimension_semantics=("parallel",),
        ),
    )(xb, w1p, b1p, w2p, b2p)

    # Slice padded batch rows / hidden columns back off (dtype already matches).
    return out[:B, :hidden_dim]


if __name__ == "__main__":
    # Small shapes consistent with the module: batch=8, input_dim=32, hidden_dim=64.
    B, input_dim, hidden_dim = 8, 32, 64

    key = jax.random.PRNGKey(0)
    kx, kw1, kb1, kw2, kb2 = jax.random.split(key, 5)

    x = jax.random.normal(kx, (B, input_dim), dtype=jnp.float32)

    # PyTorch fc weights are (out, in); we store them transposed as (in, out).
    w1 = jax.random.normal(kw1, (input_dim, hidden_dim), dtype=jnp.float32) * 0.1
    b1 = jax.random.normal(kb1, (hidden_dim,), dtype=jnp.float32) * 0.1
    w2 = jax.random.normal(kw2, (hidden_dim, hidden_dim), dtype=jnp.float32) * 0.1
    b2 = jax.random.normal(kb2, (hidden_dim,), dtype=jnp.float32) * 0.1

    # One-time parameter prep (pad + bf16 cast), hoisted out of the call path.
    padded_params, H = prepare_params(w1, b1, w2, b2)
    padded_params = jax.block_until_ready(padded_params)

    out = passing_leaders_forward(x, padded_params, H)
    out = jax.block_until_ready(out)

    # Pure-JAX f32 reference (kernel uses bf16 MXU operands -> loose tolerance).
    ref = jnp.maximum(jnp.maximum(x @ w1 + b1, 0.0) @ w2 + b2, 0.0)
    assert out.shape == (B, hidden_dim)
    assert out.dtype == x.dtype
    assert jnp.allclose(out, ref, atol=5e-2, rtol=5e-2), "mismatch vs reference"

    print("KERNEL_OK")
</pallas_src>

<mosaic_0001>
module attributes {stable_mosaic.version = 11 : i64} {
  func.func @_mlp_kernel(%arg0: i32, %arg1: memref<16x32xbf16, #tpu.memory_space<vmem>>, %arg2: memref<32x128xbf16, #tpu.memory_space<vmem>>, %arg3: memref<1x128xf32, #tpu.memory_space<vmem>>, %arg4: memref<128x128xbf16, #tpu.memory_space<vmem>>, %arg5: memref<1x128xf32, #tpu.memory_space<vmem>>, %arg6: memref<16x128xf32, #tpu.memory_space<vmem>>) attributes {dimension_semantics = [#tpu.dimension_semantics<parallel>], iteration_bounds = array<i64: 1>, scalar_prefetch = 0 : i64, scratch_operands = 0 : i64, tpu.core_type = #tpu.core_type<tc>, window_params = [{transform_indices = @transform_0, window_bounds = array<i64: 16, 32>}, {pipeline_mode = #tpu.pipeline_mode<synchronous>, transform_indices = @transform_1, window_bounds = array<i64: 32, 128>}, {pipeline_mode = #tpu.pipeline_mode<synchronous>, transform_indices = @transform_2, window_bounds = array<i64: 1, 128>}, {pipeline_mode = #tpu.pipeline_mode<synchronous>, transform_indices = @transform_3, window_bounds = array<i64: 128, 128>}, {pipeline_mode = #tpu.pipeline_mode<synchronous>, transform_indices = @transform_4, window_bounds = array<i64: 1, 128>}, {transform_indices = @transform_5, window_bounds = array<i64: 16, 128>}]} {
    %c0 = arith.constant 0 : index
    %c0_0 = arith.constant 0 : index
    %0 = vector.load %arg1[%c0, %c0_0] : memref<16x32xbf16, #tpu.memory_space<vmem>>, vector<16x32xbf16>
    %c0_1 = arith.constant 0 : index
    %c0_2 = arith.constant 0 : index
    %1 = vector.load %arg2[%c0_1, %c0_2] : memref<32x128xbf16, #tpu.memory_space<vmem>>, vector<32x128xbf16>
    %cst = arith.constant dense<0.000000e+00> : vector<16x128xf32>
    %2 = tpu.matmul %0, %1, %cst {dimension_numbers = #tpu.dot_dimension_numbers<[1], [0], [0], [1], [0, 0, 1, 1], [], []>} : vector<16x32xbf16>, vector<32x128xbf16>, vector<16x128xf32> -> vector<16x128xf32>
    %c0_3 = arith.constant 0 : index
    %c0_4 = arith.constant 0 : index
    %3 = vector.load %arg3[%c0_3, %c0_4] : memref<1x128xf32, #tpu.memory_space<vmem>>, vector<1x128xf32>
    %4 = vector.broadcast %3 : vector<1x128xf32> to vector<16x128xf32>
    %5 = arith.addf %2, %4 : vector<16x128xf32>
    %cst_5 = arith.constant 0.000000e+00 : f32
    %6 = vector.broadcast %cst_5 : f32 to vector<16x128xf32>
    %7 = arith.maximumf %5, %6 : vector<16x128xf32>
    %8 = arith.truncf %7 : vector<16x128xf32> to vector<16x128xbf16>
    %c0_6 = arith.constant 0 : index
    %c0_7 = arith.constant 0 : index
    %9 = vector.load %arg4[%c0_6, %c0_7] : memref<128x128xbf16, #tpu.memory_space<vmem>>, vector<128x128xbf16>
    %cst_8 = arith.constant dense<0.000000e+00> : vector<16x128xf32>
    %10 = tpu.matmul %8, %9, %cst_8 {dimension_numbers = #tpu.dot_dimension_numbers<[1], [0], [0], [1], [0, 0, 1, 1], [], []>} : vector<16x128xbf16>, vector<128x128xbf16>, vector<16x128xf32> -> vector<16x128xf32>
    %c0_9 = arith.constant 0 : index
    %c0_10 = arith.constant 0 : index
    %11 = vector.load %arg5[%c0_9, %c0_10] : memref<1x128xf32, #tpu.memory_space<vmem>>, vector<1x128xf32>
    %12 = vector.broadcast %11 : vector<1x128xf32> to vector<16x128xf32>
    %13 = arith.addf %10, %12 : vector<16x128xf32>
    %cst_11 = arith.constant 0.000000e+00 : f32
    %14 = vector.broadcast %cst_11 : f32 to vector<16x128xf32>
    %15 = arith.maximumf %13, %14 : vector<16x128xf32>
    %c0_12 = arith.constant 0 : index
    %c0_13 = arith.constant 0 : index
    %16 = vector.load %arg6[%c0_12, %c0_13] : memref<16x128xf32, #tpu.memory_space<vmem>>, vector<16x128xf32>
    tpu.vector_store %arg6[%c0_12, %c0_13], %15 {strides = array<i32>} : memref<16x128xf32, #tpu.memory_space<vmem>>, vector<16x128xf32>,
    return
  }
  func.func @transform_0(%arg0: i32) -> (i32, i32) {
    %c0_i32 = arith.constant 0 : i32
    %c0_i32_0 = arith.constant 0 : i32
    return %arg0, %c0_i32 : i32, i32
  }
  func.func @transform_1(%arg0: i32) -> (i32, i32) {
    %c0_i32 = arith.constant 0 : i32
    %c0_i32_0 = arith.constant 0 : i32
    %c0_i32_1 = arith.constant 0 : i32
    return %c0_i32, %c0_i32_0 : i32, i32
  }
  func.func @transform_2(%arg0: i32) -> (i32, i32) {
    %c0_i32 = arith.constant 0 : i32
    %c0_i32_0 = arith.constant 0 : i32
    %c0_i32_1 = arith.constant 0 : i32
    return %c0_i32, %c0_i32_0 : i32, i32
  }
  func.func @transform_3(%arg0: i32) -> (i32, i32) {
    %c0_i32 = arith.constant 0 : i32
    %c0_i32_0 = arith.constant 0 : i32
    %c0_i32_1 = arith.constant 0 : i32
    return %c0_i32, %c0_i32_0 : i32, i32
  }
  func.func @transform_4(%arg0: i32) -> (i32, i32) {
    %c0_i32 = arith.constant 0 : i32
    %c0_i32_0 = arith.constant 0 : i32
    %c0_i32_1 = arith.constant 0 : i32
    return %c0_i32, %c0_i32_0 : i32, i32
  }
  func.func @transform_5(%arg0: i32) -> (i32, i32) {
    %c0_i32 = arith.constant 0 : i32
    %c0_i32_0 = arith.constant 0 : i32
    return %arg0, %c0_i32 : i32, i32
  }
}

</mosaic_0001>

<bundles_post_ra>
// kernel: tpu_custom_call.1
= control target key start
LH: loop header
LB: loop body
LE: loop exit
PB: predicated region body
PF: predicated region fallthrough
CT: control target
= control target key end

     0   :  { %10 = vsyncpa [#allocation3], 0  ;;  %s447_s0 = inlined_call_operand.hbm [shape: bf16[16,32], index: 0, kind: input, shape index: {}]   ;;  %s448_s1 = inlined_call_operand.hbm [shape: bf16[32,128], index: 1, kind: input, shape index: {}]   ;;  %s449_s2 = inlined_call_operand.vmem [shape: f32[1,128], index: 2, kind: input, shape index: {}]   ;;  %s450_s3 = inlined_call_operand.hbm [shape: bf16[128,128], index: 3, kind: input, shape index: {}]   ;;  %s451_s4 = inlined_call_operand.vmem [shape: f32[1,128], index: 4, kind: input, shape index: {}]   ;;  %s452_s5 = inlined_call_operand.hbm [shape: f32[16,128], index: 5, kind: output, shape index: {}]  }
   0x1   :  { %11 = vsyncpa [#allocation6], 0 }
   0x2   :  { %12 = vsyncpa [#allocation4], 0  ;;  %s30_s20 = sshll.u32 %s448_s1, 4  ;;  %s391_s21 = smov [#allocation5]   ;;  %s31_s20 = int_to_ptr.hbm [resolvable:$true] %s30_s20 }
   0x3   :  { %s32_s22 = sshll.u32 %s391_s21, 4  ;;  %s17_s25 = sshll.u32 %s447_s0, 4  ;;  %s33_s22 = int_to_ptr.vmem [resolvable:$true] %s32_s22  ;;  %s18_s25 = int_to_ptr.hbm [resolvable:$true] %s17_s25 }
   0x4   :  { %s392_s26 = smov 64   ;;  %s393_s27 = smov 4  }
   0x5   :  { %38 = dma.hbm_to_vmem [thread:$0]  %s31_s20, 256, %s33_s22, [#allocation6], %s392_s26, %s392_s26, %s393_s27  }
   0x6   :  { %s394_s28 = smov [#allocation2]   ;;  %s45_s7 = sshll.u32 %s450_s3, 4  ;;  %s46_s7 = int_to_ptr.hbm [resolvable:$true] %s45_s7 }
   0x7   :  { %s19_s29 = sshll.u32 %s394_s28, 4  ;;  %s395_s1 = smov [#allocation7]   ;;  %s20_s29 = int_to_ptr.vmem [resolvable:$true] %s19_s29 }
   0x8   :  { %25 = dma.hbm_to_vmem [thread:$0]  %s18_s25, 128, %s20_s29, [#allocation3], %s392_s26, %s392_s26, %s393_s27  }
   0x9   :  { %s47_s8 = sshll.u32 %s395_s1, 4  ;;  %s48_s8 = int_to_ptr.vmem [resolvable:$true] %s47_s8 }
   0xa   :  { %53 = dma.hbm_to_vmem [thread:$0]  %s46_s7, 1024, %s48_s8, [#allocation6], %s392_s26, %s392_s26, %s393_s27  }
   0xb   :  { %385 = dma.done.wait [#allocation3], 128  }
   0xc   :  { %386 = vsyncadd [#allocation3], 4294967168 }
   0xd   :  { %387 = dma.done.wait [#allocation6], 1280  }
   0xe   :  { %388 = vsyncadd [#allocation6], 4294966016  ;;  %v270_v0 = vld [vmem:[#allocation5 + $0x8] sm:$0xff]  ;;  %v269_v2 = vld [vmem:[#allocation5] sm:$0xff]  ;;  %vm96_vm0 = vcmask 261120   ;;  %s396_s11 = smov [#allocation8]  }
   0xf   :  { %v278_v1 = vld [vmem:[#allocation7 + $0x38] sm:$0xff]  ;;  %106 = vmatpush.bf16.msra.mxu0 %v270_v0  ;;  %v277_v3 = vld [vmem:[#allocation7 + $0x30] sm:$0xff]  ;;  %v268_v4 = vld [vmem:[#allocation2] sm:$0xff]  ;;  %s207_s12 = sshll.u32 %s396_s11, 4  ;;  %s397_s15 = smov 128   ;;  %s208_s12 = int_to_ptr.vmem [resolvable:$true] %s207_s12 }
  0x10   :  { %185 = vmatpush.bf16.msra.mxu1 %v278_v1  ;;  %v276_v5 = vld [vmem:[#allocation7 + $0x28] sm:$0xff]  ;;  %v275_v6 = vld [vmem:[#allocation7 + $0x20] sm:$0xff]  ;;  %v274_v7 = vld [vmem:[#allocation7 + $0x18] sm:$0xff]  ;;  %s398_s16 = smov 8  }
  0x11   :  { %v273_v8 = vld [vmem:[#allocation7 + $0x10] sm:$0xff]  ;;  %v272_v9 = vld [vmem:[#allocation7 + $0x8] sm:$0xff]  ;;  %v271_v10 = vld [vmem:[#allocation7] sm:$0xff] }
  0x12   :  { %v287_v12 = vld [vmem:[%s449_s2] ss:$0 sm:$0xff]  ;;  %s209_s2 = sshll.u32 %s452_s5, 4  ;;  %s210_s2 = int_to_ptr.hbm [resolvable:$true] %s209_s2 }
  0x13   :  { %107 = vmatpush.bf16.msra.mxu0 %v269_v2  ;;  %v288_v19 = vld [vmem:[%s451_s4] ss:$0 sm:$0xff] }
  0x14   :  { %186 = vmatpush.bf16.msra.mxu1 %v277_v3 }
  0x16   :  { %235 = vmatmul.msk.bf16.vlgmr.msra.gmra.mxu0 %vm96_vm0, %v268_v4 }
  0x18   :  { %187 = vmatpush.bf16.msra.mxu1 %v276_v5 }
  0x1c   :  { %188 = vmatpush.bf16.msra.mxu1 %v275_v6 }
  0x20   :  { %189 = vmatpush.bf16.msra.mxu1 %v274_v7 }
  0x24   :  { %190 = vmatpush.bf16.msra.mxu1 %v273_v8 }
  0x28   :  { %191 = vmatpush.bf16.msra.mxu1 %v272_v9 }
  0x2c   :  { %192 = vmatpush.bf16.msra.mxu1 %v271_v10 }
  0x93   :  { %v109_v11 = vpop.f32.mrf.mxu0 }
  0x94   :  { %v110_v13 = vadd.f32 %v287_v12, %v109_v11 }
  0x96   :  { %v114_v16 = vmax.f32 %v110_v13, 0.0 }
  0x9b   :  { %v111_v14 = vpop.f32.mrf.mxu0 }
  0x9c   :  { %v112_v15 = vadd.f32 %v287_v12, %v111_v14 }
  0x9e   :  { %v115_v17 = vmax.f32 %v112_v15, 0.0 }
  0xa0   :  { %v116_v18 = vpack.c.bf16 %v115_v17, %v114_v16 }
  0xa2   :  { %193 = vmatmul.bf16.vlgmr.msra.gmra.mxu1 %v116_v18 }
 0x11f   :  { %v194_v20 = vpop.f32.mrf.mxu1 }
 0x120   :  { %v195_v21 = vadd.f32 %v288_v19, %v194_v20 }
 0x122   :  { %v199_v22 = vmax.f32 %v195_v21, 0.0 }
 0x124   :  { %201 = vst [vmem:[#allocation8] sm:$0xff] %v199_v22 }
 0x127   :  { %v196_v23 = vpop.f32.mrf.mxu1 }
 0x128   :  { %v197_v24 = vadd.f32 %v288_v19, %v196_v23 }
 0x12a   :  { %v200_v25 = vmax.f32 %v197_v24, 0.0 }
 0x12c   :  { %202 = vst [vmem:[#allocation8 + $0x8] sm:$0xff] %v200_v25 }
 0x12d   :  { %215 = dma.vmem_to_hbm [thread:$0]  %s208_s12, 256, %s210_s2, [#allocation4], %s397_s15, %s397_s15, %s398_s16  }
 0x12e   :  { %389 = dma.done.wait [#allocation4], 256  }
 0x12f   :  { %390 = vsyncadd [#allocation4], 4294967040 }
 0x130   :  { %220 = vsyncpa [#allocation3], 1 }
 0x131   :  { %221 = vsyncpa [#allocation6], 1 }
 0x132   :  { %222 = vsyncpa [#allocation4], 1 }

</bundles_post_ra>
